<compile_context>
chip_gen: v7x
topology: tpu7x:2x2x1
jax: 0.10.0
libtpu: 0.0.40
codegen_flags: <defaults>
</compile_context>

<pallas_src>
import functools

import jax
import jax.numpy as jnp
from jax import lax
from jax.experimental import pallas as pl
from jax.experimental.pallas import tpu as pltpu

_SQRT3_2 = 0.8660254037844386


def _cross(u, v):
    ux, uy, uz = u
    vx, vy, vz = v
    return (uy * vz - uz * vy, uz * vx - ux * vz, ux * vy - uy * vx)


def _best_of3(c0, n0, c1, n1, c2, n2):
    use1 = n1 > n0
    bx = jnp.where(use1, c1[0], c0[0])
    by = jnp.where(use1, c1[1], c0[1])
    bz = jnp.where(use1, c1[2], c0[2])
    bn = jnp.where(use1, n1, n0)
    use2 = n2 > bn
    bx = jnp.where(use2, c2[0], bx)
    by = jnp.where(use2, c2[1], by)
    bz = jnp.where(use2, c2[2], bz)
    bn = jnp.where(use2, n2, bn)
    return bx, by, bz, bn


def _eigvec(lam, fidx, a11, a22, a33, a12, a13, a23, p2, degen):
    """Unit eigenvector of the symmetric matrix for eigenvalue `lam`."""
    m11 = a11 - lam
    m22 = a22 - lam
    m33 = a33 - lam
    r0 = (m11, a12, a13)
    r1 = (a12, m22, a23)
    r2 = (a13, a23, m33)
    c0 = _cross(r0, r1)
    c1 = _cross(r0, r2)
    c2 = _cross(r1, r2)
    n0 = c0[0] * c0[0] + c0[1] * c0[1] + c0[2] * c0[2]
    n1 = c1[0] * c1[0] + c1[1] * c1[1] + c1[2] * c1[2]
    n2 = c2[0] * c2[0] + c2[1] * c2[1] + c2[2] * c2[2]
    bx, by, bz, bn = _best_of3(c0, n0, c1, n1, c2, n2)

    # Fallback for (near-)repeated `lam`: rows of M = A - lam*I are then
    # (near-)parallel to the isolated eigenvector, so any unit vector
    # orthogonal to the dominant row is a valid eigenvector.  For a
    # (near-)spherical matrix (degen) use the canonical axis `fidx`.
    q0 = m11 * m11 + a12 * a12 + a13 * a13
    q1 = a12 * a12 + m22 * m22 + a23 * a23
    q2 = a13 * a13 + a23 * a23 + m33 * m33
    dx, dy, dz, _ = _best_of3(r0, q0, r1, q1, r2, q2)
    w1n = dy * dy + dz * dz                      # |d x e_x|^2
    w2n = dx * dx + dz * dz                      # |d x e_y|^2
    use_w2 = w2n > w1n
    wx = jnp.where(use_w2, -dz, 0.0)
    wy = jnp.where(use_w2, 0.0, dz)
    wz = jnp.where(use_w2, dx, -dy)
    wn = jnp.where(use_w2, w2n, w1n)
    w_inv = lax.rsqrt(jnp.maximum(wn, 1e-38))
    fx = 1.0 if fidx == 0 else 0.0
    fy = 1.0 if fidx == 1 else 0.0
    fz = 1.0 if fidx == 2 else 0.0
    gx = jnp.where(degen, fx, wx * w_inv)
    gy = jnp.where(degen, fy, wy * w_inv)
    gz = jnp.where(degen, fz, wz * w_inv)

    b_inv = lax.rsqrt(jnp.maximum(bn, 1e-38))
    # relative rank test: sqrt(bn) ~ |lam-l_a|*|lam-l_b|, compared against the
    # deviatoric scale p2 (not an absolute threshold).
    use_fb = jnp.logical_or(bn * b_inv <= 1e-4 * p2, degen)
    vx = jnp.where(use_fb, gx, bx * b_inv)
    vy = jnp.where(use_fb, gy, by * b_inv)
    vz = jnp.where(use_fb, gz, bz * b_inv)
    return vx, vy, vz


def _compute_chunk(a11, a12r, a13r, a21, a22, a23r, a31, a32, a33):
    # symmetrize: (A + A^T) / 2
    a12 = 0.5 * (a12r + a21)
    a13 = 0.5 * (a13r + a31)
    a23 = 0.5 * (a23r + a32)

    fro2 = (a11 * a11 + a22 * a22 + a33 * a33
            + 2.0 * (a12 * a12 + a13 * a13 + a23 * a23))

    # Smith closed form for symmetric 3x3 eigenvalues.
    q = (a11 + a22 + a33) * (1.0 / 3.0)
    p1 = a12 * a12 + a13 * a13 + a23 * a23
    b11 = a11 - q
    b22 = a22 - q
    b33 = a33 - q
    p2 = b11 * b11 + b22 * b22 + b33 * b33 + 2.0 * p1
    degen = p2 <= 1e-12 * fro2               # (near-)spherical: l1=l2=l3=q
    p = jnp.sqrt(jnp.maximum(p2, 0.0) * (1.0 / 6.0))
    # exact divide on purpose: r feeds a sqrt-sensitive branch near r = +-1;
    # it is one op per 1024 matrices so approx reciprocal buys nothing here.
    inv_p = jnp.where(degen, 0.0, 1.0 / jnp.maximum(p, 1e-30))
    c11 = b11 * inv_p
    c22 = b22 * inv_p
    c33 = b33 * inv_p
    c12 = a12 * inv_p
    c13 = a13 * inv_p
    c23 = a23 * inv_p
    det_b = (c11 * (c22 * c33 - c23 * c23)
             - c12 * (c12 * c33 - c23 * c13)
             + c13 * (c12 * c23 - c22 * c13))
    r = jnp.clip(0.5 * det_b, -1.0, 1.0)

    # t = cos(arccos(r)/3) without arccos/cos: Newton on 4u^3 - 3u = |r| with
    # u in [sqrt(3)/2, 1] (f' = 12u^2 - 3 >= 6 there -> well conditioned),
    # then fold the sign of r back in via angle-addition identities.
    rr = jnp.abs(r)
    u = 0.8660254 + 0.1339746 * rr           # linear init, |err| < 7e-3
    for _ in range(3):
        uu = u * u
        f = (4.0 * uu - 3.0) * u - rr
        df_inv = pl.reciprocal(12.0 * uu - 3.0, approx=True)  # EUP slot; error self-corrects
        u = u - f * df_inv
    s = jnp.sqrt(jnp.maximum(1.0 - u * u, 0.0))
    neg = r < 0.0
    cos_phi = jnp.where(neg, 0.5 * u + _SQRT3_2 * s, u)
    sin_phi = jnp.where(neg, _SQRT3_2 * u - 0.5 * s, s)

    two_p = 2.0 * p
    l1 = q + two_p * cos_phi                                   # largest
    l2 = q + two_p * (-0.5 * cos_phi + _SQRT3_2 * sin_phi)     # middle
    l3 = q + two_p * (-0.5 * cos_phi - _SQRT3_2 * sin_phi)     # smallest
    l1 = jnp.where(degen, q, l1)
    l2 = jnp.where(degen, q, l2)
    l3 = jnp.where(degen, q, l3)

    v1 = _eigvec(l1, 0, a11, a22, a33, a12, a13, a23, p2, degen)
    v3 = _eigvec(l3, 2, a11, a22, a33, a12, a13, a23, p2, degen)
    # Middle eigenvector as the orthogonal complement -> orthonormal frame
    # even when l1 ~ l2 or l2 ~ l3.
    cx, cy, cz = _cross(v3, v1)
    cn = cx * cx + cy * cy + cz * cz
    c_inv = lax.rsqrt(jnp.maximum(cn, 1e-38))
    bad = cn <= 1e-12
    v2 = (jnp.where(bad, 0.0, cx * c_inv),
          jnp.where(bad, 1.0, cy * c_inv),
          jnp.where(bad, 0.0, cz * c_inv))
    return (l1, l2, l3), (v1, v2, v3)


def _make_symeig_kernel(sb):
    n_sub = sb // 8

    def kernel(x_ref, val_ref, vec_ref):
        # x_ref: (9, sb, 128) ; val_ref: (3, sb, 128) ; vec_ref: (9, sb, 128)
        def process(row):
            sl = pl.ds(row, 8)
            comps = [x_ref[c, sl, :] for c in range(9)]      # 9 x (8,128) vregs
            (l1, l2, l3), (v1, v2, v3) = _compute_chunk(*comps)
            val_ref[0, sl, :] = l1
            val_ref[1, sl, :] = l2
            val_ref[2, sl, :] = l3
            # V row-major with eigenvectors as columns: flat[3*i + j] = v_j[i]
            vec_ref[0, sl, :] = v1[0]
            vec_ref[1, sl, :] = v2[0]
            vec_ref[2, sl, :] = v3[0]
            vec_ref[3, sl, :] = v1[1]
            vec_ref[4, sl, :] = v2[1]
            vec_ref[5, sl, :] = v3[1]
            vec_ref[6, sl, :] = v1[2]
            vec_ref[7, sl, :] = v2[2]
            vec_ref[8, sl, :] = v3[2]

        if n_sub == 1:
            process(0)
        else:
            def body(j, carry):
                process(pl.multiple_of(j * 8, 8))
                return carry
            lax.fori_loop(0, n_sub, body, None)

    return kernel


def _choose_tiling(n, chunk_matrices):
    """Pick (nb, sb): total 128-lane groups (multiple of sb) and groups/step."""
    nb_min = ((n + 1023) // 1024) * 8              # needed groups, mult. of 8
    sb_max = max(8, (chunk_matrices // 1024) * 8)  # groups per grid step cap
    g = max(1, (nb_min + sb_max - 1) // sb_max)    # grid steps
    sb = (((nb_min + g - 1) // g) + 7) // 8 * 8    # groups per step, mult of 8
    return g * sb, sb


@functools.partial(jax.jit, static_argnames=("nb", "sb", "eps"))
def _sym_eig_flat(xf, key, *, nb, sb, eps):
    n = xf.shape[0]
    n_total = nb * 128
    if n_total != n:
        eye = jnp.array([1.0, 0.0, 0.0, 0.0, 1.0, 0.0, 0.0, 0.0, 1.0],
                        dtype=jnp.float32)
        xf = jnp.concatenate(
            [xf, jnp.broadcast_to(eye, (n_total - n, 9))], axis=0)
    # TODO(synk): generate the eps-noise in-kernel (pltpu.prng_seed +
    # stateful_normal) to drop this wrapper RNG pass once validated.
    noise = eps * jax.random.normal(key, (n_total, 9), dtype=jnp.float32)
    # Single fused producer under jit: pad + noise + relayout into the
    # component-major (9, nb, 128) slab (matrices run along the lane axis).
    slab = (xf + noise).T.reshape(9, nb, 128)

    vals, vecs = pl.pallas_call(
        _make_symeig_kernel(sb),
        out_shape=(jax.ShapeDtypeStruct((3, nb, 128), jnp.float32),
                   jax.ShapeDtypeStruct((9, nb, 128), jnp.float32)),
        grid=(nb // sb,),
        in_specs=[pl.BlockSpec((9, sb, 128), lambda i: (0, i, 0))],
        out_specs=(pl.BlockSpec((3, sb, 128), lambda i: (0, i, 0)),
                   pl.BlockSpec((9, sb, 128), lambda i: (0, i, 0))),
        compiler_params=pltpu.CompilerParams(
            dimension_semantics=("parallel",)),
    )(slab)

    vals = vals.reshape(3, n_total).T[:n]     # (n, 3)
    vecs = vecs.reshape(9, n_total).T[:n]     # (n, 9)
    return vals, vecs


def sym_eig(x, key, eps=1e-6, chunk_matrices=16384):
    """JAX/Pallas equivalent of SymEig.forward.  x: (..., 3, 3)."""
    batch_shape = x.shape[:-2]
    xf = x.reshape(-1, 9).astype(jnp.float32)
    nb, sb = _choose_tiling(xf.shape[0], chunk_matrices)
    vals, vecs = _sym_eig_flat(xf, key, nb=nb, sb=sb, eps=float(eps))
    return (vals.reshape(*batch_shape, 3),
            vecs.reshape(*batch_shape, 3, 3))


def _check(x, eigenvals, eigenvectors, val_tol, res_tol, orth_tol, check_vals):
    xs = 0.5 * (x + jnp.swapaxes(x, -1, -2))
    if check_vals:
        ref_vals = jnp.linalg.eigh(xs)[0]               # ascending
        got = jnp.sort(eigenvals, axis=-1)              # kernel is descending
        err = float(jnp.max(jnp.abs(got - ref_vals)))
        assert err < val_tol, f"eigenvalue mismatch: {err}"
    # eigen-residual A @ V ~= V @ diag(lambda)  (columns are eigenvectors)
    av = jnp.einsum('...ij,...jk->...ik', xs, eigenvectors)
    vl = eigenvectors * eigenvals[..., None, :]
    scale = jnp.sqrt(jnp.sum(xs * xs, axis=(-2, -1)))[..., None, None] + 1e-6
    res = float(jnp.max(jnp.abs(av - vl) / scale))
    assert res < res_tol, f"eigen-residual too large: {res}"
    # orthonormality of the eigenvector frame
    vtv = jnp.einsum('...ji,...jk->...ik', eigenvectors, eigenvectors)
    orth = float(jnp.max(jnp.abs(vtv - jnp.eye(3, dtype=vtv.dtype))))
    assert orth < orth_tol, f"eigenvectors not orthonormal: {orth}"
    assert bool(jnp.all(jnp.isfinite(eigenvals)))
    assert bool(jnp.all(jnp.isfinite(eigenvectors)))


if __name__ == "__main__":
    key = jax.random.PRNGKey(0)
    kx, kn, kx2, kn2 = jax.random.split(key, 4)

    # small deterministic example (512 matrices): single grid step, n_sub == 1
    x = jax.random.normal(kx, (2, 16, 16, 3, 3), dtype=jnp.float32)
    eigenvals, eigenvectors = sym_eig(x, kn)
    jax.block_until_ready((eigenvals, eigenvectors))
    _check(x, eigenvals, eigenvectors,
           val_tol=2e-3, res_tol=5e-3, orth_tol=2e-2, check_vals=True)

    # larger run exercising the in-kernel sublane loop and a multi-step grid
    x2 = jax.random.normal(kx2, (2, 8, 8, 32, 3, 3), dtype=jnp.float32)
    ev2, evec2 = sym_eig(x2, kn2, chunk_matrices=2048)
    jax.block_until_ready((ev2, evec2))
    _check(x2, ev2, evec2,
           val_tol=5e-3, res_tol=5e-3, orth_tol=5e-2, check_vals=False)

    print("KERNEL_OK")
</pallas_src>

<mosaic_0001>
module attributes {stable_mosaic.version = 11 : i64} {
  func.func @kernel(%arg0: i32, %arg1: memref<9x8x128xf32, #tpu.memory_space<vmem>>, %arg2: memref<3x8x128xf32, #tpu.memory_space<vmem>>, %arg3: memref<9x8x128xf32, #tpu.memory_space<vmem>>) attributes {dimension_semantics = [#tpu.dimension_semantics<parallel>], iteration_bounds = array<i64: 1>, scalar_prefetch = 0 : i64, scratch_operands = 0 : i64, tpu.core_type = #tpu.core_type<tc>, window_params = [{transform_indices = @transform_0, window_bounds = array<i64: 9, 8, 128>}, {transform_indices = @transform_1, window_bounds = array<i64: 3, 8, 128>}, {transform_indices = @transform_2, window_bounds = array<i64: 9, 8, 128>}]} {
    %c0 = arith.constant 0 : index
    %c0_0 = arith.constant 0 : index
    %c0_1 = arith.constant 0 : index
    %0 = vector.load %arg1[%c0, %c0_0, %c0_1] : memref<9x8x128xf32, #tpu.memory_space<vmem>>, vector<1x8x128xf32>
    %1 = vector.shape_cast %0 : vector<1x8x128xf32> to vector<8x128xf32>
    %c1 = arith.constant 1 : index
    %c0_2 = arith.constant 0 : index
    %c0_3 = arith.constant 0 : index
    %2 = vector.load %arg1[%c1, %c0_2, %c0_3] : memref<9x8x128xf32, #tpu.memory_space<vmem>>, vector<1x8x128xf32>
    %3 = vector.shape_cast %2 : vector<1x8x128xf32> to vector<8x128xf32>
    %c2 = arith.constant 2 : index
    %c0_4 = arith.constant 0 : index
    %c0_5 = arith.constant 0 : index
    %4 = vector.load %arg1[%c2, %c0_4, %c0_5] : memref<9x8x128xf32, #tpu.memory_space<vmem>>, vector<1x8x128xf32>
    %5 = vector.shape_cast %4 : vector<1x8x128xf32> to vector<8x128xf32>
    %c3 = arith.constant 3 : index
    %c0_6 = arith.constant 0 : index
    %c0_7 = arith.constant 0 : index
    %6 = vector.load %arg1[%c3, %c0_6, %c0_7] : memref<9x8x128xf32, #tpu.memory_space<vmem>>, vector<1x8x128xf32>
    %7 = vector.shape_cast %6 : vector<1x8x128xf32> to vector<8x128xf32>
    %c4 = arith.constant 4 : index
    %c0_8 = arith.constant 0 : index
    %c0_9 = arith.constant 0 : index
    %8 = vector.load %arg1[%c4, %c0_8, %c0_9] : memref<9x8x128xf32, #tpu.memory_space<vmem>>, vector<1x8x128xf32>
    %9 = vector.shape_cast %8 : vector<1x8x128xf32> to vector<8x128xf32>
    %c5 = arith.constant 5 : index
    %c0_10 = arith.constant 0 : index
    %c0_11 = arith.constant 0 : index
    %10 = vector.load %arg1[%c5, %c0_10, %c0_11] : memref<9x8x128xf32, #tpu.memory_space<vmem>>, vector<1x8x128xf32>
    %11 = vector.shape_cast %10 : vector<1x8x128xf32> to vector<8x128xf32>
    %c6 = arith.constant 6 : index
    %c0_12 = arith.constant 0 : index
    %c0_13 = arith.constant 0 : index
    %12 = vector.load %arg1[%c6, %c0_12, %c0_13] : memref<9x8x128xf32, #tpu.memory_space<vmem>>, vector<1x8x128xf32>
    %13 = vector.shape_cast %12 : vector<1x8x128xf32> to vector<8x128xf32>
    %c7 = arith.constant 7 : index
    %c0_14 = arith.constant 0 : index
    %c0_15 = arith.constant 0 : index
    %14 = vector.load %arg1[%c7, %c0_14, %c0_15] : memref<9x8x128xf32, #tpu.memory_space<vmem>>, vector<1x8x128xf32>
    %15 = vector.shape_cast %14 : vector<1x8x128xf32> to vector<8x128xf32>
    %c8 = arith.constant 8 : index
    %c0_16 = arith.constant 0 : index
    %c0_17 = arith.constant 0 : index
    %16 = vector.load %arg1[%c8, %c0_16, %c0_17] : memref<9x8x128xf32, #tpu.memory_space<vmem>>, vector<1x8x128xf32>
    %17 = vector.shape_cast %16 : vector<1x8x128xf32> to vector<8x128xf32>
    %18 = arith.addf %3, %7 : vector<8x128xf32>
    %cst = arith.constant 5.000000e-01 : f32
    %19 = vector.broadcast %cst : f32 to vector<8x128xf32>
    %20 = arith.mulf %19, %18 : vector<8x128xf32>
    %21 = arith.addf %5, %13 : vector<8x128xf32>
    %cst_18 = arith.constant 5.000000e-01 : f32
    %22 = vector.broadcast %cst_18 : f32 to vector<8x128xf32>
    %23 = arith.mulf %22, %21 : vector<8x128xf32>
    %24 = arith.addf %11, %15 : vector<8x128xf32>
    %cst_19 = arith.constant 5.000000e-01 : f32
    %25 = vector.broadcast %cst_19 : f32 to vector<8x128xf32>
    %26 = arith.mulf %25, %24 : vector<8x128xf32>
    %27 = arith.mulf %1, %1 : vector<8x128xf32>
    %28 = arith.mulf %9, %9 : vector<8x128xf32>
    %29 = arith.addf %27, %28 : vector<8x128xf32>
    %30 = arith.mulf %17, %17 : vector<8x128xf32>
    %31 = arith.addf %29, %30 : vector<8x128xf32>
    %32 = arith.mulf %20, %20 : vector<8x128xf32>
    %33 = arith.mulf %23, %23 : vector<8x128xf32>
    %34 = arith.addf %32, %33 : vector<8x128xf32>
    %35 = arith.mulf %26, %26 : vector<8x128xf32>
    %36 = arith.addf %34, %35 : vector<8x128xf32>
    %cst_20 = arith.constant 2.000000e+00 : f32
    %37 = vector.broadcast %cst_20 : f32 to vector<8x128xf32>
    %38 = arith.mulf %37, %36 : vector<8x128xf32>
    %39 = arith.addf %31, %38 : vector<8x128xf32>
    %40 = arith.addf %1, %9 : vector<8x128xf32>
    %41 = arith.addf %40, %17 : vector<8x128xf32>
    %cst_21 = arith.constant 0.333333343 : f32
    %42 = vector.broadcast %cst_21 : f32 to vector<8x128xf32>
    %43 = arith.mulf %41, %42 : vector<8x128xf32>
    %44 = arith.mulf %20, %20 : vector<8x128xf32>
    %45 = arith.mulf %23, %23 : vector<8x128xf32>
    %46 = arith.addf %44, %45 : vector<8x128xf32>
    %47 = arith.mulf %26, %26 : vector<8x128xf32>
    %48 = arith.addf %46, %47 : vector<8x128xf32>
    %49 = arith.subf %1, %43 : vector<8x128xf32>
    %50 = arith.subf %9, %43 : vector<8x128xf32>
    %51 = arith.subf %17, %43 : vector<8x128xf32>
    %52 = arith.mulf %49, %49 : vector<8x128xf32>
    %53 = arith.mulf %50, %50 : vector<8x128xf32>
    %54 = arith.addf %52, %53 : vector<8x128xf32>
    %55 = arith.mulf %51, %51 : vector<8x128xf32>
    %56 = arith.addf %54, %55 : vector<8x128xf32>
    %cst_22 = arith.constant 2.000000e+00 : f32
    %57 = vector.broadcast %cst_22 : f32 to vector<8x128xf32>
    %58 = arith.mulf %57, %48 : vector<8x128xf32>
    %59 = arith.addf %56, %58 : vector<8x128xf32>
    %cst_23 = arith.constant 9.99999996E-13 : f32
    %60 = vector.broadcast %cst_23 : f32 to vector<8x128xf32>
    %61 = arith.mulf %60, %39 : vector<8x128xf32>
    %62 = arith.cmpf ole, %59, %61 : vector<8x128xf32>
    %cst_24 = arith.constant 0.000000e+00 : f32
    %63 = vector.broadcast %cst_24 : f32 to vector<8x128xf32>
    %64 = arith.maximumf %59, %63 : vector<8x128xf32>
    %cst_25 = arith.constant 0.166666672 : f32
    %65 = vector.broadcast %cst_25 : f32 to vector<8x128xf32>
    %66 = arith.mulf %64, %65 : vector<8x128xf32>
    %67 = math.sqrt %66 : vector<8x128xf32>
    %cst_26 = arith.constant 1.000000e-30 : f32
    %68 = vector.broadcast %cst_26 : f32 to vector<8x128xf32>
    %69 = arith.maximumf %67, %68 : vector<8x128xf32>
    %cst_27 = arith.constant 1.000000e+00 : f32
    %70 = vector.broadcast %cst_27 : f32 to vector<8x128xf32>
    %71 = arith.divf %70, %69 : vector<8x128xf32>
    %cst_28 = arith.constant 0.000000e+00 : f32
    %72 = vector.broadcast %cst_28 : f32 to vector<8x128xf32>
    %73 = arith.select %62, %72, %71 : vector<8x128xi1>, vector<8x128xf32>
    %74 = arith.mulf %49, %73 : vector<8x128xf32>
    %75 = arith.mulf %50, %73 : vector<8x128xf32>
    %76 = arith.mulf %51, %73 : vector<8x128xf32>
    %77 = arith.mulf %20, %73 : vector<8x128xf32>
    %78 = arith.mulf %23, %73 : vector<8x128xf32>
    %79 = arith.mulf %26, %73 : vector<8x128xf32>
    %80 = arith.mulf %75, %76 : vector<8x128xf32>
    %81 = arith.mulf %79, %79 : vector<8x128xf32>
    %82 = arith.subf %80, %81 : vector<8x128xf32>
    %83 = arith.mulf %74, %82 : vector<8x128xf32>
    %84 = arith.mulf %77, %76 : vector<8x128xf32>
    %85 = arith.mulf %79, %78 : vector<8x128xf32>
    %86 = arith.subf %84, %85 : vector<8x128xf32>
    %87 = arith.mulf %77, %86 : vector<8x128xf32>
    %88 = arith.subf %83, %87 : vector<8x128xf32>
    %89 = arith.mulf %77, %79 : vector<8x128xf32>
    %90 = arith.mulf %75, %78 : vector<8x128xf32>
    %91 = arith.subf %89, %90 : vector<8x128xf32>
    %92 = arith.mulf %78, %91 : vector<8x128xf32>
    %93 = arith.addf %88, %92 : vector<8x128xf32>
    %cst_29 = arith.constant 5.000000e-01 : f32
    %94 = vector.broadcast %cst_29 : f32 to vector<8x128xf32>
    %95 = arith.mulf %94, %93 : vector<8x128xf32>
    %cst_30 = arith.constant -1.000000e+00 : f32
    %cst_31 = arith.constant 1.000000e+00 : f32
    %96 = vector.broadcast %cst_30 : f32 to vector<8x128xf32>
    %97 = arith.maximumf %96, %95 : vector<8x128xf32>
    %98 = vector.broadcast %cst_31 : f32 to vector<8x128xf32>
    %99 = arith.minimumf %98, %97 : vector<8x128xf32>
    %100 = math.absf %99 : vector<8x128xf32>
    %cst_32 = arith.constant 0.133974597 : f32
    %101 = vector.broadcast %cst_32 : f32 to vector<8x128xf32>
    %102 = arith.mulf %101, %100 : vector<8x128xf32>
    %cst_33 = arith.constant 0.866025388 : f32
    %103 = vector.broadcast %cst_33 : f32 to vector<8x128xf32>
    %104 = arith.addf %103, %102 : vector<8x128xf32>
    %105 = arith.mulf %104, %104 : vector<8x128xf32>
    %cst_34 = arith.constant 4.000000e+00 : f32
    %106 = vector.broadcast %cst_34 : f32 to vector<8x128xf32>
    %107 = arith.mulf %106, %105 : vector<8x128xf32>
    %cst_35 = arith.constant 3.000000e+00 : f32
    %108 = vector.broadcast %cst_35 : f32 to vector<8x128xf32>
    %109 = arith.subf %107, %108 : vector<8x128xf32>
    %110 = arith.mulf %109, %104 : vector<8x128xf32>
    %111 = arith.subf %110, %100 : vector<8x128xf32>
    %cst_36 = arith.constant 1.200000e+01 : f32
    %112 = vector.broadcast %cst_36 : f32 to vector<8x128xf32>
    %113 = arith.mulf %112, %105 : vector<8x128xf32>
    %cst_37 = arith.constant 3.000000e+00 : f32
    %114 = vector.broadcast %cst_37 : f32 to vector<8x128xf32>
    %115 = arith.subf %113, %114 : vector<8x128xf32>
    %116 = tpu.reciprocal %115 {approx = true} : vector<8x128xf32> -> vector<8x128xf32>
    %117 = arith.mulf %111, %116 : vector<8x128xf32>
    %118 = arith.subf %104, %117 : vector<8x128xf32>
    %119 = arith.mulf %118, %118 : vector<8x128xf32>
    %cst_38 = arith.constant 4.000000e+00 : f32
    %120 = vector.broadcast %cst_38 : f32 to vector<8x128xf32>
    %121 = arith.mulf %120, %119 : vector<8x128xf32>
    %cst_39 = arith.constant 3.000000e+00 : f32
    %122 = vector.broadcast %cst_39 : f32 to vector<8x128xf32>
    %123 = arith.subf %121, %122 : vector<8x128xf32>
    %124 = arith.mulf %123, %118 : vector<8x128xf32>
    %125 = arith.subf %124, %100 : vector<8x128xf32>
    %cst_40 = arith.constant 1.200000e+01 : f32
    %126 = vector.broadcast %cst_40 : f32 to vector<8x128xf32>
    %127 = arith.mulf %126, %119 : vector<8x128xf32>
    %cst_41 = arith.constant 3.000000e+00 : f32
    %128 = vector.broadcast %cst_41 : f32 to vector<8x128xf32>
    %129 = arith.subf %127, %128 : vector<8x128xf32>
    %130 = tpu.reciprocal %129 {approx = true} : vector<8x128xf32> -> vector<8x128xf32>
    %131 = arith.mulf %125, %130 : vector<8x128xf32>
    %132 = arith.subf %118, %131 : vector<8x128xf32>
    %133 = arith.mulf %132, %132 : vector<8x128xf32>
    %cst_42 = arith.constant 4.000000e+00 : f32
    %134 = vector.broadcast %cst_42 : f32 to vector<8x128xf32>
    %135 = arith.mulf %134, %133 : vector<8x128xf32>
    %cst_43 = arith.constant 3.000000e+00 : f32
    %136 = vector.broadcast %cst_43 : f32 to vector<8x128xf32>
    %137 = arith.subf %135, %136 : vector<8x128xf32>
    %138 = arith.mulf %137, %132 : vector<8x128xf32>
    %139 = arith.subf %138, %100 : vector<8x128xf32>
    %cst_44 = arith.constant 1.200000e+01 : f32
    %140 = vector.broadcast %cst_44 : f32 to vector<8x128xf32>
    %141 = arith.mulf %140, %133 : vector<8x128xf32>
    %cst_45 = arith.constant 3.000000e+00 : f32
    %142 = vector.broadcast %cst_45 : f32 to vector<8x128xf32>
    %143 = arith.subf %141, %142 : vector<8x128xf32>
    %144 = tpu.reciprocal %143 {approx = true} : vector<8x128xf32> -> vector<8x128xf32>
    %145 = arith.mulf %139, %144 : vector<8x128xf32>
    %146 = arith.subf %132, %145 : vector<8x128xf32>
    %147 = arith.mulf %146, %146 : vector<8x128xf32>
    %cst_46 = arith.constant 1.000000e+00 : f32
    %148 = vector.broadcast %cst_46 : f32 to vector<8x128xf32>
    %149 = arith.subf %148, %147 : vector<8x128xf32>
    %cst_47 = arith.constant 0.000000e+00 : f32
    %150 = vector.broadcast %cst_47 : f32 to vector<8x128xf32>
    %151 = arith.maximumf %149, %150 : vector<8x128xf32>
    %152 = math.sqrt %151 : vector<8x128xf32>
    %cst_48 = arith.constant 0.000000e+00 : f32
    %153 = vector.broadcast %cst_48 : f32 to vector<8x128xf32>
    %154 = arith.cmpf olt, %99, %153 : vector<8x128xf32>
    %cst_49 = arith.constant 5.000000e-01 : f32
    %155 = vector.broadcast %cst_49 : f32 to vector<8x128xf32>
    %156 = arith.mulf %155, %146 : vector<8x128xf32>
    %cst_50 = arith.constant 0.866025388 : f32
    %157 = vector.broadcast %cst_50 : f32 to vector<8x128xf32>
    %158 = arith.mulf %157, %152 : vector<8x128xf32>
    %159 = arith.addf %156, %158 : vector<8x128xf32>
    %160 = arith.select %154, %159, %146 : vector<8x128xi1>, vector<8x128xf32>
    %cst_51 = arith.constant 0.866025388 : f32
    %161 = vector.broadcast %cst_51 : f32 to vector<8x128xf32>
    %162 = arith.mulf %161, %146 : vector<8x128xf32>
    %cst_52 = arith.constant 5.000000e-01 : f32
    %163 = vector.broadcast %cst_52 : f32 to vector<8x128xf32>
    %164 = arith.mulf %163, %152 : vector<8x128xf32>
    %165 = arith.subf %162, %164 : vector<8x128xf32>
    %166 = arith.select %154, %165, %152 : vector<8x128xi1>, vector<8x128xf32>
    %cst_53 = arith.constant 2.000000e+00 : f32
    %167 = vector.broadcast %cst_53 : f32 to vector<8x128xf32>
    %168 = arith.mulf %167, %67 : vector<8x128xf32>
    %169 = arith.mulf %168, %160 : vector<8x128xf32>
    %170 = arith.addf %43, %169 : vector<8x128xf32>
    %cst_54 = arith.constant -5.000000e-01 : f32
    %171 = vector.broadcast %cst_54 : f32 to vector<8x128xf32>
    %172 = arith.mulf %171, %160 : vector<8x128xf32>
    %cst_55 = arith.constant 0.866025388 : f32
    %173 = vector.broadcast %cst_55 : f32 to vector<8x128xf32>
    %174 = arith.mulf %173, %166 : vector<8x128xf32>
    %175 = arith.addf %172, %174 : vector<8x128xf32>
    %176 = arith.mulf %168, %175 : vector<8x128xf32>
    %177 = arith.addf %43, %176 : vector<8x128xf32>
    %cst_56 = arith.constant -5.000000e-01 : f32
    %178 = vector.broadcast %cst_56 : f32 to vector<8x128xf32>
    %179 = arith.mulf %178, %160 : vector<8x128xf32>
    %cst_57 = arith.constant 0.866025388 : f32
    %180 = vector.broadcast %cst_57 : f32 to vector<8x128xf32>
    %181 = arith.mulf %180, %166 : vector<8x128xf32>
    %182 = arith.subf %179, %181 : vector<8x128xf32>
    %183 = arith.mulf %168, %182 : vector<8x128xf32>
    %184 = arith.addf %43, %183 : vector<8x128xf32>
    %185 = arith.select %62, %43, %170 : vector<8x128xi1>, vector<8x128xf32>
    %186 = arith.select %62, %43, %177 : vector<8x128xi1>, vector<8x128xf32>
    %187 = arith.select %62, %43, %184 : vector<8x128xi1>, vector<8x128xf32>
    %188 = arith.subf %1, %185 : vector<8x128xf32>
    %189 = arith.subf %9, %185 : vector<8x128xf32>
    %190 = arith.subf %17, %185 : vector<8x128xf32>
    %191 = arith.mulf %20, %26 : vector<8x128xf32>
    %192 = arith.mulf %23, %189 : vector<8x128xf32>
    %193 = arith.subf %191, %192 : vector<8x128xf32>
    %194 = arith.mulf %23, %20 : vector<8x128xf32>
    %195 = arith.mulf %188, %26 : vector<8x128xf32>
    %196 = arith.subf %194, %195 : vector<8x128xf32>
    %197 = arith.mulf %188, %189 : vector<8x128xf32>
    %198 = arith.mulf %20, %20 : vector<8x128xf32>
    %199 = arith.subf %197, %198 : vector<8x128xf32>
    %200 = arith.mulf %20, %190 : vector<8x128xf32>
    %201 = arith.mulf %23, %26 : vector<8x128xf32>
    %202 = arith.subf %200, %201 : vector<8x128xf32>
    %203 = arith.mulf %23, %23 : vector<8x128xf32>
    %204 = arith.mulf %188, %190 : vector<8x128xf32>
    %205 = arith.subf %203, %204 : vector<8x128xf32>
    %206 = arith.mulf %188, %26 : vector<8x128xf32>
    %207 = arith.mulf %20, %23 : vector<8x128xf32>
    %208 = arith.subf %206, %207 : vector<8x128xf32>
    %209 = arith.mulf %189, %190 : vector<8x128xf32>
    %210 = arith.mulf %26, %26 : vector<8x128xf32>
    %211 = arith.subf %209, %210 : vector<8x128xf32>
    %212 = arith.mulf %26, %23 : vector<8x128xf32>
    %213 = arith.mulf %20, %190 : vector<8x128xf32>
    %214 = arith.subf %212, %213 : vector<8x128xf32>
    %215 = arith.mulf %20, %26 : vector<8x128xf32>
    %216 = arith.mulf %189, %23 : vector<8x128xf32>
    %217 = arith.subf %215, %216 : vector<8x128xf32>
    %218 = arith.mulf %193, %193 : vector<8x128xf32>
    %219 = arith.mulf %196, %196 : vector<8x128xf32>
    %220 = arith.addf %218, %219 : vector<8x128xf32>
    %221 = arith.mulf %199, %199 : vector<8x128xf32>
    %222 = arith.addf %220, %221 : vector<8x128xf32>
    %223 = arith.mulf %202, %202 : vector<8x128xf32>
    %224 = arith.mulf %205, %205 : vector<8x128xf32>
    %225 = arith.addf %223, %224 : vector<8x128xf32>
    %226 = arith.mulf %208, %208 : vector<8x128xf32>
    %227 = arith.addf %225, %226 : vector<8x128xf32>
    %228 = arith.mulf %211, %211 : vector<8x128xf32>
    %229 = arith.mulf %214, %214 : vector<8x128xf32>
    %230 = arith.addf %228, %229 : vector<8x128xf32>
    %231 = arith.mulf %217, %217 : vector<8x128xf32>
    %232 = arith.addf %230, %231 : vector<8x128xf32>
    %233 = arith.cmpf ogt, %227, %222 : vector<8x128xf32>
    %234 = arith.select %233, %202, %193 : vector<8x128xi1>, vector<8x128xf32>
    %235 = arith.select %233, %205, %196 : vector<8x128xi1>, vector<8x128xf32>
    %236 = arith.select %233, %208, %199 : vector<8x128xi1>, vector<8x128xf32>
    %237 = arith.select %233, %227, %222 : vector<8x128xi1>, vector<8x128xf32>
    %238 = arith.cmpf ogt, %232, %237 : vector<8x128xf32>
    %239 = arith.select %238, %211, %234 : vector<8x128xi1>, vector<8x128xf32>
    %240 = arith.select %238, %214, %235 : vector<8x128xi1>, vector<8x128xf32>
    %241 = arith.select %238, %217, %236 : vector<8x128xi1>, vector<8x128xf32>
    %242 = arith.select %238, %232, %237 : vector<8x128xi1>, vector<8x128xf32>
    %243 = arith.mulf %188, %188 : vector<8x128xf32>
    %244 = arith.mulf %20, %20 : vector<8x128xf32>
    %245 = arith.addf %243, %244 : vector<8x128xf32>
    %246 = arith.mulf %23, %23 : vector<8x128xf32>
    %247 = arith.addf %245, %246 : vector<8x128xf32>
    %248 = arith.mulf %20, %20 : vector<8x128xf32>
    %249 = arith.mulf %189, %189 : vector<8x128xf32>
    %250 = arith.addf %248, %249 : vector<8x128xf32>
    %251 = arith.mulf %26, %26 : vector<8x128xf32>
    %252 = arith.addf %250, %251 : vector<8x128xf32>
    %253 = arith.mulf %23, %23 : vector<8x128xf32>
    %254 = arith.mulf %26, %26 : vector<8x128xf32>
    %255 = arith.addf %253, %254 : vector<8x128xf32>
    %256 = arith.mulf %190, %190 : vector<8x128xf32>
    %257 = arith.addf %255, %256 : vector<8x128xf32>
    %258 = arith.cmpf ogt, %252, %247 : vector<8x128xf32>
    %259 = arith.select %258, %20, %188 : vector<8x128xi1>, vector<8x128xf32>
    %260 = arith.select %258, %189, %20 : vector<8x128xi1>, vector<8x128xf32>
    %261 = arith.select %258, %26, %23 : vector<8x128xi1>, vector<8x128xf32>
    %262 = arith.select %258, %252, %247 : vector<8x128xi1>, vector<8x128xf32>
    %263 = arith.cmpf ogt, %257, %262 : vector<8x128xf32>
    %264 = arith.select %263, %23, %259 : vector<8x128xi1>, vector<8x128xf32>
    %265 = arith.select %263, %26, %260 : vector<8x128xi1>, vector<8x128xf32>
    %266 = arith.select %263, %190, %261 : vector<8x128xi1>, vector<8x128xf32>
    %267 = arith.mulf %265, %265 : vector<8x128xf32>
    %268 = arith.mulf %266, %266 : vector<8x128xf32>
    %269 = arith.addf %267, %268 : vector<8x128xf32>
    %270 = arith.mulf %264, %264 : vector<8x128xf32>
    %271 = arith.mulf %266, %266 : vector<8x128xf32>
    %272 = arith.addf %270, %271 : vector<8x128xf32>
    %273 = arith.cmpf ogt, %272, %269 : vector<8x128xf32>
    %cst_58 = arith.constant 0.000000e+00 : f32
    %274 = vector.broadcast %cst_58 : f32 to vector<8x128xf32>
    %275 = arith.subf %274, %266 : vector<8x128xf32>
    %cst_59 = arith.constant 0.000000e+00 : f32
    %276 = vector.broadcast %cst_59 : f32 to vector<8x128xf32>
    %277 = arith.select %273, %275, %276 : vector<8x128xi1>, vector<8x128xf32>
    %cst_60 = arith.constant 0.000000e+00 : f32
    %278 = vector.broadcast %cst_60 : f32 to vector<8x128xf32>
    %279 = arith.select %273, %278, %266 : vector<8x128xi1>, vector<8x128xf32>
    %cst_61 = arith.constant 0.000000e+00 : f32
    %280 = vector.broadcast %cst_61 : f32 to vector<8x128xf32>
    %281 = arith.subf %280, %265 : vector<8x128xf32>
    %282 = arith.select %273, %264, %281 : vector<8x128xi1>, vector<8x128xf32>
    %283 = arith.select %273, %272, %269 : vector<8x128xi1>, vector<8x128xf32>
    %cst_62 = arith.constant 9.99999935E-39 : f32
    %284 = vector.broadcast %cst_62 : f32 to vector<8x128xf32>
    %285 = arith.maximumf %283, %284 : vector<8x128xf32>
    %286 = math.rsqrt %285 : vector<8x128xf32>
    %287 = arith.mulf %277, %286 : vector<8x128xf32>
    %cst_63 = arith.constant 1.000000e+00 : f32
    %288 = vector.broadcast %cst_63 : f32 to vector<8x128xf32>
    %289 = arith.select %62, %288, %287 : vector<8x128xi1>, vector<8x128xf32>
    %290 = arith.mulf %279, %286 : vector<8x128xf32>
    %cst_64 = arith.constant 0.000000e+00 : f32
    %291 = vector.broadcast %cst_64 : f32 to vector<8x128xf32>
    %292 = arith.select %62, %291, %290 : vector<8x128xi1>, vector<8x128xf32>
    %293 = arith.mulf %282, %286 : vector<8x128xf32>
    %cst_65 = arith.constant 0.000000e+00 : f32
    %294 = vector.broadcast %cst_65 : f32 to vector<8x128xf32>
    %295 = arith.select %62, %294, %293 : vector<8x128xi1>, vector<8x128xf32>
    %cst_66 = arith.constant 9.99999935E-39 : f32
    %296 = vector.broadcast %cst_66 : f32 to vector<8x128xf32>
    %297 = arith.maximumf %242, %296 : vector<8x128xf32>
    %298 = math.rsqrt %297 : vector<8x128xf32>
    %299 = arith.mulf %242, %298 : vector<8x128xf32>
    %cst_67 = arith.constant 9.99999974E-5 : f32
    %300 = vector.broadcast %cst_67 : f32 to vector<8x128xf32>
    %301 = arith.mulf %300, %59 : vector<8x128xf32>
    %302 = arith.cmpf ole, %299, %301 : vector<8x128xf32>
    %303 = arith.ori %302, %62 : vector<8x128xi1>
    %304 = arith.mulf %239, %298 : vector<8x128xf32>
    %305 = arith.select %303, %289, %304 : vector<8x128xi1>, vector<8x128xf32>
    %306 = arith.mulf %240, %298 : vector<8x128xf32>
    %307 = arith.select %303, %292, %306 : vector<8x128xi1>, vector<8x128xf32>
    %308 = arith.mulf %241, %298 : vector<8x128xf32>
    %309 = arith.select %303, %295, %308 : vector<8x128xi1>, vector<8x128xf32>
    %310 = arith.subf %1, %187 : vector<8x128xf32>
    %311 = arith.subf %9, %187 : vector<8x128xf32>
    %312 = arith.subf %17, %187 : vector<8x128xf32>
    %313 = arith.mulf %20, %26 : vector<8x128xf32>
    %314 = arith.mulf %23, %311 : vector<8x128xf32>
    %315 = arith.subf %313, %314 : vector<8x128xf32>
    %316 = arith.mulf %23, %20 : vector<8x128xf32>
    %317 = arith.mulf %310, %26 : vector<8x128xf32>
    %318 = arith.subf %316, %317 : vector<8x128xf32>
    %319 = arith.mulf %310, %311 : vector<8x128xf32>
    %320 = arith.mulf %20, %20 : vector<8x128xf32>
    %321 = arith.subf %319, %320 : vector<8x128xf32>
    %322 = arith.mulf %20, %312 : vector<8x128xf32>
    %323 = arith.mulf %23, %26 : vector<8x128xf32>
    %324 = arith.subf %322, %323 : vector<8x128xf32>
    %325 = arith.mulf %23, %23 : vector<8x128xf32>
    %326 = arith.mulf %310, %312 : vector<8x128xf32>
    %327 = arith.subf %325, %326 : vector<8x128xf32>
    %328 = arith.mulf %310, %26 : vector<8x128xf32>
    %329 = arith.mulf %20, %23 : vector<8x128xf32>
    %330 = arith.subf %328, %329 : vector<8x128xf32>
    %331 = arith.mulf %311, %312 : vector<8x128xf32>
    %332 = arith.mulf %26, %26 : vector<8x128xf32>
    %333 = arith.subf %331, %332 : vector<8x128xf32>
    %334 = arith.mulf %26, %23 : vector<8x128xf32>
    %335 = arith.mulf %20, %312 : vector<8x128xf32>
    %336 = arith.subf %334, %335 : vector<8x128xf32>
    %337 = arith.mulf %20, %26 : vector<8x128xf32>
    %338 = arith.mulf %311, %23 : vector<8x128xf32>
    %339 = arith.subf %337, %338 : vector<8x128xf32>
    %340 = arith.mulf %315, %315 : vector<8x128xf32>
    %341 = arith.mulf %318, %318 : vector<8x128xf32>
    %342 = arith.addf %340, %341 : vector<8x128xf32>
    %343 = arith.mulf %321, %321 : vector<8x128xf32>
    %344 = arith.addf %342, %343 : vector<8x128xf32>
    %345 = arith.mulf %324, %324 : vector<8x128xf32>
    %346 = arith.mulf %327, %327 : vector<8x128xf32>
    %347 = arith.addf %345, %346 : vector<8x128xf32>
    %348 = arith.mulf %330, %330 : vector<8x128xf32>
    %349 = arith.addf %347, %348 : vector<8x128xf32>
    %350 = arith.mulf %333, %333 : vector<8x128xf32>
    %351 = arith.mulf %336, %336 : vector<8x128xf32>
    %352 = arith.addf %350, %351 : vector<8x128xf32>
    %353 = arith.mulf %339, %339 : vector<8x128xf32>
    %354 = arith.addf %352, %353 : vector<8x128xf32>
    %355 = arith.cmpf ogt, %349, %344 : vector<8x128xf32>
    %356 = arith.select %355, %324, %315 : vector<8x128xi1>, vector<8x128xf32>
    %357 = arith.select %355, %327, %318 : vector<8x128xi1>, vector<8x128xf32>
    %358 = arith.select %355, %330, %321 : vector<8x128xi1>, vector<8x128xf32>
    %359 = arith.select %355, %349, %344 : vector<8x128xi1>, vector<8x128xf32>
    %360 = arith.cmpf ogt, %354, %359 : vector<8x128xf32>
    %361 = arith.select %360, %333, %356 : vector<8x128xi1>, vector<8x128xf32>
    %362 = arith.select %360, %336, %357 : vector<8x128xi1>, vector<8x128xf32>
    %363 = arith.select %360, %339, %358 : vector<8x128xi1>, vector<8x128xf32>
    %364 = arith.select %360, %354, %359 : vector<8x128xi1>, vector<8x128xf32>
    %365 = arith.mulf %310, %310 : vector<8x128xf32>
    %366 = arith.mulf %20, %20 : vector<8x128xf32>
    %367 = arith.addf %365, %366 : vector<8x128xf32>
    %368 = arith.mulf %23, %23 : vector<8x128xf32>
    %369 = arith.addf %367, %368 : vector<8x128xf32>
    %370 = arith.mulf %20, %20 : vector<8x128xf32>
    %371 = arith.mulf %311, %311 : vector<8x128xf32>
    %372 = arith.addf %370, %371 : vector<8x128xf32>
    %373 = arith.mulf %26, %26 : vector<8x128xf32>
    %374 = arith.addf %372, %373 : vector<8x128xf32>
    %375 = arith.mulf %23, %23 : vector<8x128xf32>
    %376 = arith.mulf %26, %26 : vector<8x128xf32>
    %377 = arith.addf %375, %376 : vector<8x128xf32>
    %378 = arith.mulf %312, %312 : vector<8x128xf32>
    %379 = arith.addf %377, %378 : vector<8x128xf32>
    %380 = arith.cmpf ogt, %374, %369 : vector<8x128xf32>
    %381 = arith.select %380, %20, %310 : vector<8x128xi1>, vector<8x128xf32>
    %382 = arith.select %380, %311, %20 : vector<8x128xi1>, vector<8x128xf32>
    %383 = arith.select %380, %26, %23 : vector<8x128xi1>, vector<8x128xf32>
    %384 = arith.select %380, %374, %369 : vector<8x128xi1>, vector<8x128xf32>
    %385 = arith.cmpf ogt, %379, %384 : vector<8x128xf32>
    %386 = arith.select %385, %23, %381 : vector<8x128xi1>, vector<8x128xf32>
    %387 = arith.select %385, %26, %382 : vector<8x128xi1>, vector<8x128xf32>
    %388 = arith.select %385, %312, %383 : vector<8x128xi1>, vector<8x128xf32>
    %389 = arith.mulf %387, %387 : vector<8x128xf32>
    %390 = arith.mulf %388, %388 : vector<8x128xf32>
    %391 = arith.addf %389, %390 : vector<8x128xf32>
    %392 = arith.mulf %386, %386 : vector<8x128xf32>
    %393 = arith.mulf %388, %388 : vector<8x128xf32>
    %394 = arith.addf %392, %393 : vector<8x128xf32>
    %395 = arith.cmpf ogt, %394, %391 : vector<8x128xf32>
    %cst_68 = arith.constant 0.000000e+00 : f32
    %396 = vector.broadcast %cst_68 : f32 to vector<8x128xf32>
    %397 = arith.subf %396, %388 : vector<8x128xf32>
    %cst_69 = arith.constant 0.000000e+00 : f32
    %398 = vector.broadcast %cst_69 : f32 to vector<8x128xf32>
    %399 = arith.select %395, %397, %398 : vector<8x128xi1>, vector<8x128xf32>
    %cst_70 = arith.constant 0.000000e+00 : f32
    %400 = vector.broadcast %cst_70 : f32 to vector<8x128xf32>
    %401 = arith.select %395, %400, %388 : vector<8x128xi1>, vector<8x128xf32>
    %cst_71 = arith.constant 0.000000e+00 : f32
    %402 = vector.broadcast %cst_71 : f32 to vector<8x128xf32>
    %403 = arith.subf %402, %387 : vector<8x128xf32>
    %404 = arith.select %395, %386, %403 : vector<8x128xi1>, vector<8x128xf32>
    %405 = arith.select %395, %394, %391 : vector<8x128xi1>, vector<8x128xf32>
    %cst_72 = arith.constant 9.99999935E-39 : f32
    %406 = vector.broadcast %cst_72 : f32 to vector<8x128xf32>
    %407 = arith.maximumf %405, %406 : vector<8x128xf32>
    %408 = math.rsqrt %407 : vector<8x128xf32>
    %409 = arith.mulf %399, %408 : vector<8x128xf32>
    %cst_73 = arith.constant 0.000000e+00 : f32
    %410 = vector.broadcast %cst_73 : f32 to vector<8x128xf32>
    %411 = arith.select %62, %410, %409 : vector<8x128xi1>, vector<8x128xf32>
    %412 = arith.mulf %401, %408 : vector<8x128xf32>
    %cst_74 = arith.constant 0.000000e+00 : f32
    %413 = vector.broadcast %cst_74 : f32 to vector<8x128xf32>
    %414 = arith.select %62, %413, %412 : vector<8x128xi1>, vector<8x128xf32>
    %415 = arith.mulf %404, %408 : vector<8x128xf32>
    %cst_75 = arith.constant 1.000000e+00 : f32
    %416 = vector.broadcast %cst_75 : f32 to vector<8x128xf32>
    %417 = arith.select %62, %416, %415 : vector<8x128xi1>, vector<8x128xf32>
    %cst_76 = arith.constant 9.99999935E-39 : f32
    %418 = vector.broadcast %cst_76 : f32 to vector<8x128xf32>
    %419 = arith.maximumf %364, %418 : vector<8x128xf32>
    %420 = math.rsqrt %419 : vector<8x128xf32>
    %421 = arith.mulf %364, %420 : vector<8x128xf32>
    %cst_77 = arith.constant 9.99999974E-5 : f32
    %422 = vector.broadcast %cst_77 : f32 to vector<8x128xf32>
    %423 = arith.mulf %422, %59 : vector<8x128xf32>
    %424 = arith.cmpf ole, %421, %423 : vector<8x128xf32>
    %425 = arith.ori %424, %62 : vector<8x128xi1>
    %426 = arith.mulf %361, %420 : vector<8x128xf32>
    %427 = arith.select %425, %411, %426 : vector<8x128xi1>, vector<8x128xf32>
    %428 = arith.mulf %362, %420 : vector<8x128xf32>
    %429 = arith.select %425, %414, %428 : vector<8x128xi1>, vector<8x128xf32>
    %430 = arith.mulf %363, %420 : vector<8x128xf32>
    %431 = arith.select %425, %417, %430 : vector<8x128xi1>, vector<8x128xf32>
    %432 = arith.mulf %429, %309 : vector<8x128xf32>
    %433 = arith.mulf %431, %307 : vector<8x128xf32>
    %434 = arith.subf %432, %433 : vector<8x128xf32>
    %435 = arith.mulf %431, %305 : vector<8x128xf32>
    %436 = arith.mulf %427, %309 : vector<8x128xf32>
    %437 = arith.subf %435, %436 : vector<8x128xf32>
    %438 = arith.mulf %427, %307 : vector<8x128xf32>
    %439 = arith.mulf %429, %305 : vector<8x128xf32>
    %440 = arith.subf %438, %439 : vector<8x128xf32>
    %441 = arith.mulf %434, %434 : vector<8x128xf32>
    %442 = arith.mulf %437, %437 : vector<8x128xf32>
    %443 = arith.addf %441, %442 : vector<8x128xf32>
    %444 = arith.mulf %440, %440 : vector<8x128xf32>
    %445 = arith.addf %443, %444 : vector<8x128xf32>
    %cst_78 = arith.constant 9.99999935E-39 : f32
    %446 = vector.broadcast %cst_78 : f32 to vector<8x128xf32>
    %447 = arith.maximumf %445, %446 : vector<8x128xf32>
    %448 = math.rsqrt %447 : vector<8x128xf32>
    %cst_79 = arith.constant 9.99999996E-13 : f32
    %449 = vector.broadcast %cst_79 : f32 to vector<8x128xf32>
    %450 = arith.cmpf ole, %445, %449 : vector<8x128xf32>
    %451 = arith.mulf %434, %448 : vector<8x128xf32>
    %cst_80 = arith.constant 0.000000e+00 : f32
    %452 = vector.broadcast %cst_80 : f32 to vector<8x128xf32>
    %453 = arith.select %450, %452, %451 : vector<8x128xi1>, vector<8x128xf32>
    %454 = arith.mulf %437, %448 : vector<8x128xf32>
    %cst_81 = arith.constant 1.000000e+00 : f32
    %455 = vector.broadcast %cst_81 : f32 to vector<8x128xf32>
    %456 = arith.select %450, %455, %454 : vector<8x128xi1>, vector<8x128xf32>
    %457 = arith.mulf %440, %448 : vector<8x128xf32>
    %cst_82 = arith.constant 0.000000e+00 : f32
    %458 = vector.broadcast %cst_82 : f32 to vector<8x128xf32>
    %459 = arith.select %450, %458, %457 : vector<8x128xi1>, vector<8x128xf32>
    %c0_83 = arith.constant 0 : index
    %c0_84 = arith.constant 0 : index
    %c0_85 = arith.constant 0 : index
    %460 = vector.load %arg2[%c0_83, %c0_84, %c0_85] : memref<3x8x128xf32, #tpu.memory_space<vmem>>, vector<1x8x128xf32>
    %461 = vector.shape_cast %460 : vector<1x8x128xf32> to vector<8x128xf32>
    %462 = vector.shape_cast %185 : vector<8x128xf32> to vector<1x8x128xf32>
    tpu.vector_store %arg2[%c0_83, %c0_84, %c0_85], %462 {strides = array<i32>} : memref<3x8x128xf32, #tpu.memory_space<vmem>>, vector<1x8x128xf32>,
    %c1_86 = arith.constant 1 : index
    %c0_87 = arith.constant 0 : index
    %c0_88 = arith.constant 0 : index
    %463 = vector.load %arg2[%c1_86, %c0_87, %c0_88] : memref<3x8x128xf32, #tpu.memory_space<vmem>>, vector<1x8x128xf32>
    %464 = vector.shape_cast %463 : vector<1x8x128xf32> to vector<8x128xf32>
    %465 = vector.shape_cast %186 : vector<8x128xf32> to vector<1x8x128xf32>
    tpu.vector_store %arg2[%c1_86, %c0_87, %c0_88], %465 {strides = array<i32>} : memref<3x8x128xf32, #tpu.memory_space<vmem>>, vector<1x8x128xf32>,
    %c2_89 = arith.constant 2 : index
    %c0_90 = arith.constant 0 : index
    %c0_91 = arith.constant 0 : index
    %466 = vector.load %arg2[%c2_89, %c0_90, %c0_91] : memref<3x8x128xf32, #tpu.memory_space<vmem>>, vector<1x8x128xf32>
    %467 = vector.shape_cast %466 : vector<1x8x128xf32> to vector<8x128xf32>
    %468 = vector.shape_cast %187 : vector<8x128xf32> to vector<1x8x128xf32>
    tpu.vector_store %arg2[%c2_89, %c0_90, %c0_91], %468 {strides = array<i32>} : memref<3x8x128xf32, #tpu.memory_space<vmem>>, vector<1x8x128xf32>,
    %c0_92 = arith.constant 0 : index
    %c0_93 = arith.constant 0 : index
    %c0_94 = arith.constant 0 : index
    %469 = vector.load %arg3[%c0_92, %c0_93, %c0_94] : memref<9x8x128xf32, #tpu.memory_space<vmem>>, vector<1x8x128xf32>
    %470 = vector.shape_cast %469 : vector<1x8x128xf32> to vector<8x128xf32>
    %471 = vector.shape_cast %305 : vector<8x128xf32> to vector<1x8x128xf32>
    tpu.vector_store %arg3[%c0_92, %c0_93, %c0_94], %471 {strides = array<i32>} : memref<9x8x128xf32, #tpu.memory_space<vmem>>, vector<1x8x128xf32>,
    %c1_95 = arith.constant 1 : index
    %c0_96 = arith.constant 0 : index
    %c0_97 = arith.constant 0 : index
    %472 = vector.load %arg3[%c1_95, %c0_96, %c0_97] : memref<9x8x128xf32, #tpu.memory_space<vmem>>, vector<1x8x128xf32>
    %473 = vector.shape_cast %472 : vector<1x8x128xf32> to vector<8x128xf32>
    %474 = vector.shape_cast %453 : vector<8x128xf32> to vector<1x8x128xf32>
    tpu.vector_store %arg3[%c1_95, %c0_96, %c0_97], %474 {strides = array<i32>} : memref<9x8x128xf32, #tpu.memory_space<vmem>>, vector<1x8x128xf32>,
    %c2_98 = arith.constant 2 : index
    %c0_99 = arith.constant 0 : index
    %c0_100 = arith.constant 0 : index
    %475 = vector.load %arg3[%c2_98, %c0_99, %c0_100] : memref<9x8x128xf32, #tpu.memory_space<vmem>>, vector<1x8x128xf32>
    %476 = vector.shape_cast %475 : vector<1x8x128xf32> to vector<8x128xf32>
    %477 = vector.shape_cast %427 : vector<8x128xf32> to vector<1x8x128xf32>
    tpu.vector_store %arg3[%c2_98, %c0_99, %c0_100], %477 {strides = array<i32>} : memref<9x8x128xf32, #tpu.memory_space<vmem>>, vector<1x8x128xf32>,
    %c3_101 = arith.constant 3 : index
    %c0_102 = arith.constant 0 : index
    %c0_103 = arith.constant 0 : index
    %478 = vector.load %arg3[%c3_101, %c0_102, %c0_103] : memref<9x8x128xf32, #tpu.memory_space<vmem>>, vector<1x8x128xf32>
    %479 = vector.shape_cast %478 : vector<1x8x128xf32> to vector<8x128xf32>
    %480 = vector.shape_cast %307 : vector<8x128xf32> to vector<1x8x128xf32>
    tpu.vector_store %arg3[%c3_101, %c0_102, %c0_103], %480 {strides = array<i32>} : memref<9x8x128xf32, #tpu.memory_space<vmem>>, vector<1x8x128xf32>,
    %c4_104 = arith.constant 4 : index
    %c0_105 = arith.constant 0 : index
    %c0_106 = arith.constant 0 : index
    %481 = vector.load %arg3[%c4_104, %c0_105, %c0_106] : memref<9x8x128xf32, #tpu.memory_space<vmem>>, vector<1x8x128xf32>
    %482 = vector.shape_cast %481 : vector<1x8x128xf32> to vector<8x128xf32>
    %483 = vector.shape_cast %456 : vector<8x128xf32> to vector<1x8x128xf32>
    tpu.vector_store %arg3[%c4_104, %c0_105, %c0_106], %483 {strides = array<i32>} : memref<9x8x128xf32, #tpu.memory_space<vmem>>, vector<1x8x128xf32>,
    %c5_107 = arith.constant 5 : index
    %c0_108 = arith.constant 0 : index
    %c0_109 = arith.constant 0 : index
    %484 = vector.load %arg3[%c5_107, %c0_108, %c0_109] : memref<9x8x128xf32, #tpu.memory_space<vmem>>, vector<1x8x128xf32>
    %485 = vector.shape_cast %484 : vector<1x8x128xf32> to vector<8x128xf32>
    %486 = vector.shape_cast %429 : vector<8x128xf32> to vector<1x8x128xf32>
    tpu.vector_store %arg3[%c5_107, %c0_108, %c0_109], %486 {strides = array<i32>} : memref<9x8x128xf32, #tpu.memory_space<vmem>>, vector<1x8x128xf32>,
    %c6_110 = arith.constant 6 : index
    %c0_111 = arith.constant 0 : index
    %c0_112 = arith.constant 0 : index
    %487 = vector.load %arg3[%c6_110, %c0_111, %c0_112] : memref<9x8x128xf32, #tpu.memory_space<vmem>>, vector<1x8x128xf32>
    %488 = vector.shape_cast %487 : vector<1x8x128xf32> to vector<8x128xf32>
    %489 = vector.shape_cast %309 : vector<8x128xf32> to vector<1x8x128xf32>
    tpu.vector_store %arg3[%c6_110, %c0_111, %c0_112], %489 {strides = array<i32>} : memref<9x8x128xf32, #tpu.memory_space<vmem>>, vector<1x8x128xf32>,
    %c7_113 = arith.constant 7 : index
    %c0_114 = arith.constant 0 : index
    %c0_115 = arith.constant 0 : index
    %490 = vector.load %arg3[%c7_113, %c0_114, %c0_115] : memref<9x8x128xf32, #tpu.memory_space<vmem>>, vector<1x8x128xf32>
    %491 = vector.shape_cast %490 : vector<1x8x128xf32> to vector<8x128xf32>
    %492 = vector.shape_cast %459 : vector<8x128xf32> to vector<1x8x128xf32>
    tpu.vector_store %arg3[%c7_113, %c0_114, %c0_115], %492 {strides = array<i32>} : memref<9x8x128xf32, #tpu.memory_space<vmem>>, vector<1x8x128xf32>,
    %c8_116 = arith.constant 8 : index
    %c0_117 = arith.constant 0 : index
    %c0_118 = arith.constant 0 : index
    %493 = vector.load %arg3[%c8_116, %c0_117, %c0_118] : memref<9x8x128xf32, #tpu.memory_space<vmem>>, vector<1x8x128xf32>
    %494 = vector.shape_cast %493 : vector<1x8x128xf32> to vector<8x128xf32>
    %495 = vector.shape_cast %431 : vector<8x128xf32> to vector<1x8x128xf32>
    tpu.vector_store %arg3[%c8_116, %c0_117, %c0_118], %495 {strides = array<i32>} : memref<9x8x128xf32, #tpu.memory_space<vmem>>, vector<1x8x128xf32>,
    return
  }
  func.func @transform_0(%arg0: i32) -> (i32, i32, i32) {
    %c0_i32 = arith.constant 0 : i32
    %c0_i32_0 = arith.constant 0 : i32
    %c0_i32_1 = arith.constant 0 : i32
    return %c0_i32, %arg0, %c0_i32_0 : i32, i32, i32
  }
  func.func @transform_1(%arg0: i32) -> (i32, i32, i32) {
    %c0_i32 = arith.constant 0 : i32
    %c0_i32_0 = arith.constant 0 : i32
    %c0_i32_1 = arith.constant 0 : i32
    return %c0_i32, %arg0, %c0_i32_0 : i32, i32, i32
  }
  func.func @transform_2(%arg0: i32) -> (i32, i32, i32) {
    %c0_i32 = arith.constant 0 : i32
    %c0_i32_0 = arith.constant 0 : i32
    %c0_i32_1 = arith.constant 0 : i32
    return %c0_i32, %arg0, %c0_i32_0 : i32, i32, i32
  }
}

</mosaic_0001>

<bundles_post_ra>
// kernel: _sym_eig_flat.1
= control target key start
LH: loop header
LB: loop body
LE: loop exit
PB: predicated region body
PF: predicated region fallthrough
CT: control target
= control target key end

     0   :  { %s910_s0 = inlined_call_operand.vmem [shape: f32[9,8,128], index: 0, kind: input, shape index: {}]   ;;  %s911_s1 = inlined_call_operand.vmem [shape: f32[3,8,128], index: 1, kind: output, shape index: {0}]   ;;  %s912_s2 = inlined_call_operand.vmem [shape: f32[9,8,128], index: 2, kind: output, shape index: {1}]  }
   0x1   :  { %v462_v0 = vld [vmem:[%s910_s0] sm:$0xff]  ;;  %v397_v1 = vld [vmem:[%s910_s0 + $0x8] sm:$0xff]  ;;  %v398_v2 = vld [vmem:[%s910_s0 + $0x10] sm:$0xff] }
   0x2   :  { %v399_v3 = vld [vmem:[%s910_s0 + $0x18] sm:$0xff]  ;;  %v476_v4 = vld [vmem:[%s910_s0 + $0x20] sm:$0xff]  ;;  %v401_v5 = vld [vmem:[%s910_s0 + $0x28] sm:$0xff]  ;;  %v33_v35 = vmul.f32 %v462_v0, %v462_v0 }
   0x3   :  { %v402_v6 = vld [vmem:[%s910_s0 + $0x30] sm:$0xff]  ;;  %v403_v7 = vld [vmem:[%s910_s0 + $0x38] sm:$0xff]  ;;  %v490_v8 = vld [vmem:[%s910_s0 + $0x40] sm:$0xff]  ;;  %v27_v9 = vadd.f32 %v399_v3, %v397_v1  ;;  %v45_v10 = vadd.f32 %v476_v4, %v462_v0  ;;  %v34_v36 = vmul.f32 %v476_v4, %v476_v4 }
   0x4   :  { %v29_v11 = vadd.f32 %v402_v6, %v398_v2  ;;  %v31_v12 = vadd.f32 %v403_v7, %v401_v5  ;;  %v36_v38 = vmul.f32 %v490_v8, %v490_v8 }
   0x5   :  { %v494_v13 = vmul.f32 0.5, %v27_v9  ;;  %v46_v14 = vadd.f32 %v490_v8, %v45_v10  ;;  %v35_v37 = vadd.f32 %v34_v36, %v33_v35 }
   0x6   :  { %v497_v15 = vmul.f32 0.5, %v29_v11  ;;  %v499_v16 = vmul.f32 0.5, %v31_v12 }
   0x7   :  { %v503_v17 = vmul.f32 %v494_v13, %v494_v13  ;;  %v505_v18 = vmul.f32 0.33333334, %v46_v14  ;;  %v37_v42 = vadd.f32 %v36_v38, %v35_v37 }
   0x8   :  { %v509_v19 = vmul.f32 %v497_v15, %v497_v15  ;;  %v513_v20 = vmul.f32 %v499_v16, %v499_v16 }
   0x9   :  { %v48_v21 = vsub.f32 %v462_v0, %v505_v18  ;;  %v49_v22 = vsub.f32 %v476_v4, %v505_v18  ;;  %v50_v23 = vsub.f32 %v490_v8, %v505_v18 }
   0xa   :  { %v40_v24 = vadd.f32 %v509_v19, %v503_v17 }
   0xb   :  { %v51_v25 = vmul.f32 %v48_v21, %v48_v21  ;;  %v52_v26 = vmul.f32 %v49_v22, %v49_v22  ;;  %v54_v27 = vmul.f32 %v50_v23, %v50_v23 }
   0xc   :  { %v42_v28 = vadd.f32 %v513_v20, %v40_v24 }
   0xd   :  { %v53_v29 = vadd.f32 %v52_v26, %v51_v25 }
   0xe   :  { %v43_v30 = vmul.f32 2.0, %v42_v28 }
   0xf   :  { %v55_v31 = vadd.f32 %v54_v27, %v53_v29 }
  0x10   :  { %v44_v46 = vadd.f32 %v43_v30, %v37_v42 }
  0x11   :  { %v524_v32 = vadd.f32 %v55_v31, %v43_v30 }
  0x12   :  { %v57_v47 = vmul.f32 1e-12, %v44_v46 }
  0x13   :  { %v59_v33 = vmax.f32 %v524_v32, 0.0 }
  0x14   :  { %vm537_vm2 = vcmp.le.f32.partialorder %v524_v32, %v57_v47 }
  0x15   :  { %v60_v34 = vmul.f32 0.16666667, %v59_v33 }
  0x17   :  { %422 = vrsqrt.f32 %v60_v34  ;;  %vm63_vm0 = vcmp.eq.f32.partialorder %v60_v34, inf  ;;  %v66_v40 = vand.u32 2147483648, %v60_v34  ;;  %vm65_vm1 = vcmp.eq.f32.partialorder %v60_v34, 0.0 }
  0x21   :  { %v423_v39 = vpop.eup %422 }
  0x22   :  { %v62_v41 = vmul.f32 %v423_v39, %v60_v34 }
  0x24   :  { %v64_v43 = vsel %vm63_vm0, %v60_v34, %v62_v41 }
  0x25   :  { %v533_v44 = vsel %vm65_vm1, %v66_v40, %v64_v43 }
  0x26   :  { %v68_v45 = vmax.f32 %v533_v44, 1e-30 }
  0x28   :  { %424 = vrcp.f32 %v68_v45 }
  0x32   :  { %v425_v49 = vpop.eup %424 }
  0x33   :  { %v71_v50 = vsel %vm537_vm2, 0.0, %v425_v49 }
  0x34   :  { %v73_v51 = vmul.f32 %v71_v50, %v49_v22  ;;  %v74_v52 = vmul.f32 %v71_v50, %v50_v23  ;;  %v75_v53 = vmul.f32 %v71_v50, %v494_v13  ;;  %v76_v54 = vmul.f32 %v71_v50, %v497_v15 }
  0x35   :  { %v77_v55 = vmul.f32 %v71_v50, %v499_v16  ;;  %v72_v56 = vmul.f32 %v71_v50, %v48_v21 }
  0x36   :  { %v78_v57 = vmul.f32 %v74_v52, %v73_v51  ;;  %v82_v58 = vmul.f32 %v75_v53, %v74_v52  ;;  %v88_v62 = vmul.f32 %v76_v54, %v73_v51 }
  0x37   :  { %v79_v59 = vmul.f32 %v77_v55, %v77_v55  ;;  %v83_v60 = vmul.f32 %v77_v55, %v76_v54  ;;  %v87_v61 = vmul.f32 %v77_v55, %v75_v53 }
  0x39   :  { %v80_v63 = vsub.f32 %v78_v57, %v79_v59  ;;  %v84_v1 = vsub.f32 %v82_v58, %v83_v60  ;;  %v89_v2 = vsub.f32 %v87_v61, %v88_v62 }
  0x3b   :  { %v81_v3 = vmul.f32 %v80_v63, %v72_v56  ;;  %v85_v5 = vmul.f32 %v84_v1, %v75_v53  ;;  %v90_v6 = vmul.f32 %v89_v2, %v76_v54 }
  0x3d   :  { %v86_v7 = vsub.f32 %v81_v3, %v85_v5  ;;  %v147_v5 = vmul.f32 2.0, %v533_v44 }
  0x3f   :  { %v91_v9 = vadd.f32 %v90_v6, %v86_v7 }
  0x41   :  { %v92_v10 = vmul.f32 0.5, %v91_v9 }
  0x43   :  { %v405_v11 = vclamps-f32 %v92_v10, 1.0 }
  0x45   :  { %v95_v12 = vand.u32 2147483647, %v405_v11  ;;  %vm138_vm5 = vcmp.lt.f32.partialorder %v405_v11, 0.0 }
  0x47   :  { %v96_v14 = vmul.f32 0.1339746, %v95_v12 }
  0x49   :  { %v97_v22 = vadd.f32 0.8660254, %v96_v14 }
  0x4b   :  { %v98_v21 = vmul.f32 %v97_v22, %v97_v22 }
  0x4d   :  { %v99_v23 = vmul.f32 4.0, %v98_v21  ;;  %v103_v24 = vmul.f32 12.0, %v98_v21 }
  0x4f   :  { %v407_v25 = vadd.f32 -3.0, %v103_v24  ;;  %v406_v26 = vadd.f32 -3.0, %v99_v23 }
  0x51   :  { %426 = vrcp.f32 %v407_v25  ;;  %v101_v27 = vmul.f32 %v406_v26, %v97_v22 }
  0x53   :  { %v102_v28 = vsub.f32 %v101_v27, %v95_v12 }
  0x5b   :  { %v427_v29 = vpop.eup %426 }
  0x5c   :  { %v106_v30 = vmul.f32 %v427_v29, %v102_v28  ;;  %v565_v29 = vmul.f32 %v497_v15, %v494_v13 }
  0x5e   :  { %v107_v31 = vsub.f32 %v97_v22, %v106_v30 }
  0x60   :  { %v108_v33 = vmul.f32 %v107_v31, %v107_v31 }
  0x62   :  { %v109_v34 = vmul.f32 4.0, %v108_v33  ;;  %v113_v35 = vmul.f32 12.0, %v108_v33  ;;  %v164_v33 = vmul.f32 %v499_v16, %v494_v13 }
  0x64   :  { %v409_v36 = vadd.f32 -3.0, %v113_v35  ;;  %v408_v37 = vadd.f32 -3.0, %v109_v34 }
  0x66   :  { %428 = vrcp.f32 %v409_v36  ;;  %v111_v38 = vmul.f32 %v408_v37, %v107_v31 }
  0x68   :  { %v112_v39 = vsub.f32 %v111_v38, %v95_v12 }
  0x70   :  { %v429_v40 = vpop.eup %428 }
  0x71   :  { %v116_v41 = vmul.f32 %v429_v40, %v112_v39  ;;  %v587_v40 = vmul.f32 %v499_v16, %v497_v15 }
  0x73   :  { %v117_v42 = vsub.f32 %v107_v31, %v116_v41 }
  0x75   :  { %v118_v43 = vmul.f32 %v117_v42, %v117_v42 }
  0x77   :  { %v119_v45 = vmul.f32 4.0, %v118_v43  ;;  %v123_v46 = vmul.f32 12.0, %v118_v43 }
  0x79   :  { %v411_v47 = vadd.f32 -3.0, %v123_v46  ;;  %v410_v49 = vadd.f32 -3.0, %v119_v45 }
  0x7b   :  { %430 = vrcp.f32 %v411_v47  ;;  %v121_v50 = vmul.f32 %v410_v49, %v117_v42  ;;  %v612_v47 = vadd.f32 %v513_v20, %v509_v19 }
  0x7d   :  { %v122_v51 = vsub.f32 %v121_v50, %v95_v12 }
  0x85   :  { %v431_v52 = vpop.eup %430 }
  0x86   :  { %v126_v53 = vmul.f32 %v431_v52, %v122_v51 }
  0x88   :  { %v127_v54 = vsub.f32 %v117_v42, %v126_v53 }
  0x8a   :  { %v128_v55 = vmul.f32 %v127_v54, %v127_v54  ;;  %v139_v62 = vmul.f32 0.5, %v127_v54  ;;  %v143_v63 = vmul.f32 0.8660254, %v127_v54 }
  0x8c   :  { %v129_v56 = vsub.f32 1.0, %v128_v55 }
  0x8e   :  { %v130_v57 = vmax.f32 %v129_v56, 0.0 }
  0x90   :  { %432 = vrsqrt.f32 %v130_v57  ;;  %vm133_vm3 = vcmp.eq.f32.partialorder %v130_v57, inf  ;;  %v136_v59 = vand.u32 2147483648, %v130_v57  ;;  %vm135_vm4 = vcmp.eq.f32.partialorder %v130_v57, 0.0 }
  0x9a   :  { %v433_v58 = vpop.eup %432 }
  0x9b   :  { %v132_v60 = vmul.f32 %v433_v58, %v130_v57 }
  0x9d   :  { %v134_v61 = vsel %vm133_vm3, %v130_v57, %v132_v60 }
  0x9e   :  { %v137_v1 = vsel %vm135_vm4, %v136_v59, %v134_v61 }
  0x9f   :  { %v140_v2 = vmul.f32 0.8660254, %v137_v1  ;;  %v144_v3 = vmul.f32 0.5, %v137_v1 }
  0xa1   :  { %v141_v6 = vadd.f32 %v140_v2, %v139_v62  ;;  %v145_v7 = vsub.f32 %v143_v63, %v144_v3 }
  0xa3   :  { %v142_v9 = vsel %vm138_vm5, %v141_v6, %v127_v54  ;;  %v146_v10 = vsel %vm138_vm5, %v145_v7, %v137_v1 }
  0xa4   :  { %v148_v12 = vmul.f32 %v147_v5, %v142_v9  ;;  %v150_v14 = vmul.f32 -0.5, %v142_v9  ;;  %v151_v22 = vmul.f32 0.8660254, %v146_v10 }
  0xa6   :  { %v149_v21 = vadd.f32 %v148_v12, %v505_v18  ;;  %v152_v23 = vadd.f32 %v151_v22, %v150_v14  ;;  %v155_v24 = vsub.f32 %v150_v14, %v151_v22 }
  0xa8   :  { %v158_v25 = vsel %vm537_vm2, %v505_v18, %v149_v21  ;;  %v153_v26 = vmul.f32 %v152_v23, %v147_v5  ;;  %v156_v27 = vmul.f32 %v155_v24, %v147_v5 }
  0xa9   :  { %v552_v11 = vsub.f32 %v462_v0, %v158_v25  ;;  %v555_v44 = vsub.f32 %v476_v4, %v158_v25  ;;  %v558_v28 = vsub.f32 %v490_v8, %v158_v25  ;;  %367 = vst [vmem:[%s911_s1] sm:$0xff] %v158_v25 }
  0xaa   :  { %v154_v30 = vadd.f32 %v153_v26, %v505_v18  ;;  %v157_v31 = vadd.f32 %v156_v27, %v505_v18 }
  0xab   :  { %v168_v34 = vmul.f32 %v552_v11, %v499_v16  ;;  %v170_v35 = vmul.f32 %v555_v44, %v552_v11  ;;  %v175_v36 = vmul.f32 %v558_v28, %v552_v11  ;;  %v165_v39 = vmul.f32 %v555_v44, %v497_v15 }
  0xac   :  { %v159_v37 = vsel %vm537_vm2, %v505_v18, %v154_v30  ;;  %v160_v38 = vsel %vm537_vm2, %v505_v18, %v157_v31  ;;  %v172_v43 = vmul.f32 %v558_v28, %v494_v13  ;;  %v205_v45 = vmul.f32 %v552_v11, %v552_v11 }
  0xad   :  { %412 = vst [vmem:[%s911_s1 + $0x8] sm:$0xff] %v159_v37  ;;  %413 = vst [vmem:[%s911_s1 + $0x10] sm:$0xff] %v160_v38  ;;  %v596_v41 = vsub.f32 %v565_v29, %v168_v34  ;;  %v598_v42 = vsub.f32 %v164_v33, %v165_v39  ;;  %v601_v18 = vsub.f32 %v170_v35, %v503_v17 }
  0xae   :  { %v608_v46 = vsub.f32 %v509_v19, %v175_v36  ;;  %v208_v49 = vmul.f32 %v555_v44, %v555_v44  ;;  %v617_v50 = vsub.f32 %v462_v0, %v160_v38  ;;  %v620_v51 = vsub.f32 %v172_v43, %v587_v40 }
  0xaf   :  { %v623_v52 = vsub.f32 %v168_v34, %v565_v29  ;;  %v178_v53 = vmul.f32 %v558_v28, %v555_v44  ;;  %v628_v54 = vsub.f32 %v587_v40, %v172_v43  ;;  %v181_v55 = vmul.f32 %v598_v42, %v598_v42 }
  0xb0   :  { %v182_v56 = vmul.f32 %v596_v41, %v596_v41  ;;  %v635_v0 = vsub.f32 %v476_v4, %v160_v38  ;;  %v638_v57 = vsub.f32 %v490_v8, %v160_v38  ;;  %v184_v58 = vmul.f32 %v601_v18, %v601_v18 }
  0xb1   :  { %v186_v59 = vmul.f32 %v620_v51, %v620_v51  ;;  %v645_v60 = vsub.f32 %v178_v53, %v513_v20  ;;  %v187_v62 = vmul.f32 %v608_v46, %v608_v46  ;;  %v189_v4 = vmul.f32 %v623_v52, %v623_v52 }
  0xb2   :  { %v183_v61 = vadd.f32 %v182_v56, %v181_v55  ;;  %v260_v8 = vmul.f32 %v617_v50, %v499_v16  ;;  %v192_v63 = vmul.f32 %v628_v54, %v628_v54  ;;  %v206_v1 = vadd.f32 %v205_v45, %v503_v17 }
  0xb3   :  { %v209_v2 = vadd.f32 %v208_v49, %v503_v17  ;;  %v188_v5 = vadd.f32 %v187_v62, %v186_v59  ;;  %v191_v6 = vmul.f32 %v645_v60, %v645_v60  ;;  %v212_v7 = vmul.f32 %v558_v28, %v558_v28 }
  0xb4   :  { %v657_v3 = vadd.f32 %v184_v58, %v183_v61  ;;  %v262_v9 = vmul.f32 %v635_v0, %v617_v50  ;;  %v207_v10 = vadd.f32 %v206_v1, %v509_v19  ;;  %v258_v14 = vmul.f32 %v635_v0, %v497_v15 }
  0xb5   :  { %v210_v12 = vadd.f32 %v209_v2, %v513_v20  ;;  %v266_v22 = vmul.f32 %v638_v57, %v617_v50  ;;  %v269_v21 = vmul.f32 %v638_v57, %v635_v0  ;;  %v673_v23 = vadd.f32 %v189_v4, %v188_v5 }
  0xb6   :  { %v193_v24 = vadd.f32 %v192_v63, %v191_v6  ;;  %v296_v25 = vmul.f32 %v617_v50, %v617_v50  ;;  %v299_v26 = vmul.f32 %v635_v0, %v635_v0  ;;  %v264_v27 = vmul.f32 %v638_v57, %v494_v13 }
  0xb7   :  { %vm214_vm6 = vcmp.gt.f32.partialorder %v210_v12, %v207_v10  ;;  %vm195_vm7 = vcmp.gt.f32.partialorder %v673_v23, %v657_v3  ;;  %v213_v31 = vadd.f32 %v212_v7, %v612_v47  ;;  %v687_v34 = vsub.f32 %v565_v29, %v260_v8 }
  0xb8   :  { %v681_v30 = vadd.f32 %v193_v24, %v181_v55  ;;  %v694_v35 = vsel %vm195_vm7, %v673_v23, %v657_v3  ;;  %v215_v36 = vsel %vm214_vm6, %v494_v13, %v552_v11  ;;  %v698_v37 = vsub.f32 %v164_v33, %v258_v14 }
  0xb9   :  { %v701_v38 = vsub.f32 %v262_v9, %v503_v17  ;;  %v216_v39 = vsel %vm214_vm6, %v555_v44, %v494_v13  ;;  %v217_v43 = vsel %vm214_vm6, %v499_v16, %v497_v15  ;;  %v218_v45 = vsel %vm214_vm6, %v210_v12, %v207_v10 }
  0xba   :  { %vm200_vm8 = vcmp.gt.f32.partialorder %v681_v30, %v694_v35  ;;  %v715_v33 = vsub.f32 %v264_v27, %v587_v40  ;;  %v718_v49 = vsub.f32 %v509_v19, %v266_v22  ;;  %v721_v53 = vsub.f32 %v260_v8, %v565_v29 }
  0xbb   :  { %v204_v11 = vsel %vm200_vm8, %v681_v30, %v694_v35  ;;  %vm219_vm9 = vcmp.gt.f32.partialorder %v213_v31, %v218_v45  ;;  %v724_v55 = vsub.f32 %v269_v21, %v513_v20  ;;  %v727_v56 = vsub.f32 %v587_v40, %v264_v27 }
  0xbc   :  { %v243_v44 = vmax.f32 %v204_v11, 1e-38  ;;  %v730_v58 = vsel %vm219_vm9, %v497_v15, %v215_v36  ;;  %v733_v59 = vsel %vm219_vm9, %v499_v16, %v216_v39  ;;  %v222_v61 = vsel %vm219_vm9, %v558_v28, %v217_v43 }
  0xbd   :  { %v272_v29 = vmul.f32 %v698_v37, %v698_v37  ;;  %v297_v62 = vadd.f32 %v296_v25, %v503_v17  ;;  %v223_v4 = vmul.f32 %v733_v59, %v733_v59  ;;  %v224_v8 = vmul.f32 %v222_v61, %v222_v61 }
  0xbe   :  { %v226_v40 = vmul.f32 %v730_v58, %v730_v58  ;;  %v300_v63 = vadd.f32 %v299_v26, %v503_v17  ;;  %434 = vrsqrt.f32 %v243_v44  ;;  %v273_v1 = vmul.f32 %v687_v34, %v687_v34 }
  0xbf   :  { %v275_v28 = vmul.f32 %v701_v38, %v701_v38  ;;  %v225_v2 = vadd.f32 %v224_v8, %v223_v4  ;;  %v277_v6 = vmul.f32 %v715_v33, %v715_v33  ;;  %v278_v7 = vmul.f32 %v718_v49, %v718_v49 }
  0xc0   :  { %v227_v5 = vadd.f32 %v226_v40, %v224_v8  ;;  %v274_v9 = vadd.f32 %v273_v1, %v272_v29  ;;  %v280_v10 = vmul.f32 %v721_v53, %v721_v53  ;;  %v282_v17 = vmul.f32 %v724_v55, %v724_v55 }
  0xc1   :  { %v283_v12 = vmul.f32 %v727_v56, %v727_v56  ;;  %v279_v14 = vadd.f32 %v278_v7, %v277_v6  ;;  %v298_v21 = vadd.f32 %v297_v62, %v509_v19  ;;  %v301_v24 = vadd.f32 %v300_v63, %v513_v20 }
  0xc2   :  { %vm228_vm10 = vcmp.gt.f32.partialorder %v227_v5, %v225_v2  ;;  %v761_v26 = vadd.f32 %v275_v28, %v274_v9  ;;  %v302_v36 = vmul.f32 %v638_v57, %v638_v57  ;;  %v196_v39 = vsel %vm195_vm7, %v620_v51, %v598_v42 }
  0xc3   :  { %v234_v22 = vsel %vm228_vm10, %v227_v5, %v225_v2  ;;  %v763_v27 = vadd.f32 %v280_v10, %v279_v14  ;;  %v284_v31 = vadd.f32 %v283_v12, %v282_v17  ;;  %v197_v19 = vsel %vm195_vm7, %v608_v46, %v596_v41 }
  0xc4   :  { %v235_v25 = vmax.f32 %v234_v22, 1e-38  ;;  %v782_v20 = vmul.f32 0.0001, %v524_v32  ;;  %vm304_vm12 = vcmp.gt.f32.partialorder %v301_v24, %v298_v21  ;;  %v198_v45 = vsel %vm195_vm7, %v623_v52, %v601_v18 }
  0xc5   :  { %v772_v43 = vadd.f32 %v284_v31, %v272_v29  ;;  %vm286_vm11 = vcmp.gt.f32.partialorder %v763_v27, %v761_v26  ;;  %v229_v44 = vsub.f32 0.0, %v222_v61  ;;  %v303_v32 = vadd.f32 %v302_v36, %v612_v47 }
  0xc6   :  { %436 = vrsqrt.f32 %v235_v25  ;;  %v789_v51 = vsel %vm286_vm11, %v763_v27, %v761_v26  ;;  %v201_v46 = vsel %vm200_vm8, %v645_v60, %v196_v39  ;;  %v232_v29 = vsub.f32 0.0, %v733_v59 }
  0xc7   :  { %vm291_vm13 = vcmp.gt.f32.partialorder %v772_v43, %v789_v51  ;;  %v305_v3 = vsel %vm304_vm12, %v494_v13, %v617_v50  ;;  %v306_v47 = vsel %vm304_vm12, %v635_v0, %v494_v13  ;;  %v307_v23 = vsel %vm304_vm12, %v499_v16, %v497_v15 }
  0xc8   :  { %v435_v41 = vpop.eup %434  ;;  %v295_v18 = vsel %vm291_vm13, %v772_v43, %v789_v51  ;;  %v202_v60 = vsel %vm200_vm8, %v628_v54, %v197_v19  ;;  %v203_v59 = vsel %vm200_vm8, %v598_v42, %v198_v45  ;;  %v230_v50 = vsel %vm228_vm10, %v229_v44, 0.0 }
  0xc9   :  { %v245_v52 = vmul.f32 %v435_v41, %v204_v11  ;;  %v308_v11 = vsel %vm304_vm12, %v301_v24, %v298_v21  ;;  %v333_v62 = vmax.f32 %v295_v18, 1e-38  ;;  %v231_v4 = vsel %vm228_vm10, 0.0, %v222_v61 }
  0xca   :  { %vm309_vm15 = vcmp.gt.f32.partialorder %v303_v32, %v308_v11  ;;  %v233_v30 = vsel %vm228_vm10, %v730_v58, %v232_v29  ;;  %v249_v40 = vmul.f32 %v435_v41, %v201_v46  ;;  %v251_v1 = vmul.f32 %v435_v41, %v202_v60 }
  0xcb   :  { %vm247_vm14 = vcmp.le.f32.partialorder %v245_v52, %v782_v20  ;;  %v310_v13 = vsel %vm309_vm15, %v497_v15, %v305_v3  ;;  %v311_v0 = vsel %vm309_vm15, %v499_v16, %v306_v47  ;;  %v312_v54 = vsel %vm309_vm15, %v638_v57, %v307_v23 }
  0xcc   :  { %438 = vrsqrt.f32 %v333_v62  ;;  %v313_v42 = vmul.f32 %v311_v0, %v311_v0  ;;  %v314_v35 = vmul.f32 %v312_v54, %v312_v54  ;;  %v316_v8 = vmul.f32 %v310_v13, %v310_v13  ;;  %vm248_vm0 = vmor %vm247_vm14, %vm537_vm2 }
  0xcd   :  { %v253_v61 = vmul.f32 %v435_v41, %v203_v59  ;;  %v287_v21 = vsel %vm286_vm11, %v715_v33, %v698_v37  ;;  %v288_v24 = vsel %vm286_vm11, %v718_v49, %v687_v34  ;;  %v289_v25 = vsel %vm286_vm11, %v721_v53, %v701_v38 }
  0xce   :  { %v315_v28 = vadd.f32 %v314_v35, %v313_v42  ;;  %v317_v6 = vadd.f32 %v316_v8, %v314_v35  ;;  %v319_v31 = vsub.f32 0.0, %v312_v54  ;;  %v322_v36 = vsub.f32 0.0, %v311_v0 }
  0xcf   :  { %v292_v39 = vsel %vm291_vm13, %v724_v55, %v287_v21  ;;  %v293_v33 = vsel %vm291_vm13, %v727_v56, %v288_v24  ;;  %v294_v34 = vsel %vm291_vm13, %v698_v37, %v289_v25 }
  0xd0   :  { %v437_v63 = vpop.eup %436  ;;  %vm318_vm1 = vcmp.gt.f32.partialorder %v317_v6, %v315_v28 }
  0xd1   :  { %v237_v7 = vmul.f32 %v437_v63, %v230_v50  ;;  %v239_v9 = vmul.f32 %v437_v63, %v231_v4  ;;  %v241_v15 = vmul.f32 %v437_v63, %v233_v30  ;;  %v324_v17 = vsel %vm318_vm1, %v317_v6, %v315_v28 }
  0xd2   :  { %v325_v12 = vmax.f32 %v324_v17, 1e-38  ;;  %v320_v49 = vsel %vm318_vm1, %v319_v31, 0.0  ;;  %v321_v38 = vsel %vm318_vm1, 0.0, %v312_v54  ;;  %v323_v53 = vsel %vm318_vm1, %v310_v13, %v322_v36 }
  0xd3   :  { %v238_v16 = vsel %vm537_vm2, 1.0, %v237_v7  ;;  %v240_v57 = vsel %vm537_vm2, 0.0, %v239_v9  ;;  %v242_v58 = vsel %vm537_vm2, 0.0, %v241_v15 }
  0xd4   :  { %v250_v2 = vsel %vm248_vm0, %v238_v16, %v249_v40  ;;  %v252_v5 = vsel %vm248_vm0, %v240_v57, %v251_v1  ;;  %v254_v10 = vsel %vm248_vm0, %v242_v58, %v253_v61  ;;  %440 = vrsqrt.f32 %v325_v12 }
  0xd5   :  { %372 = vst [vmem:[%s912_s2] sm:$0xff] %v250_v2  ;;  %416 = vst [vmem:[%s912_s2 + $0x18] sm:$0xff] %v252_v5 }
  0xd6   :  { %419 = vst [vmem:[%s912_s2 + $0x30] sm:$0xff] %v254_v10  ;;  %v439_v14 = vpop.eup %438 }
  0xd7   :  { %v335_v22 = vmul.f32 %v439_v14, %v295_v18  ;;  %v338_v27 = vmul.f32 %v439_v14, %v292_v39  ;;  %v340_v19 = vmul.f32 %v439_v14, %v293_v33  ;;  %v342_v55 = vmul.f32 %v439_v14, %v294_v34 }
  0xd9   :  { %vm336_vm3 = vcmp.le.f32.partialorder %v335_v22, %v782_v20 }
  0xda   :  { %vm337_vm4 = vmor %vm336_vm3, %vm537_vm2 }
  0xde   :  { %v441_v26 = vpop.eup %440 }
  0xdf   :  { %v327_v45 = vmul.f32 %v441_v26, %v320_v49  ;;  %v329_v44 = vmul.f32 %v441_v26, %v321_v38  ;;  %v331_v32 = vmul.f32 %v441_v26, %v323_v53 }
  0xe1   :  { %v328_v37 = vsel %vm537_vm2, 0.0, %v327_v45  ;;  %v330_v56 = vsel %vm537_vm2, 0.0, %v329_v44  ;;  %v332_v43 = vsel %vm537_vm2, 1.0, %v331_v32 }
  0xe2   :  { %v339_v51 = vsel %vm337_vm4, %v328_v37, %v338_v27  ;;  %v341_v41 = vsel %vm337_vm4, %v330_v56, %v340_v19  ;;  %v343_v46 = vsel %vm337_vm4, %v332_v43, %v342_v55 }
  0xe3   :  { %v347_v29 = vmul.f32 %v343_v46, %v250_v2  ;;  %v348_v18 = vmul.f32 %v339_v51, %v254_v10  ;;  %v350_v52 = vmul.f32 %v339_v51, %v252_v5  ;;  %v351_v3 = vmul.f32 %v341_v41, %v250_v2  ;;  %415 = vst [vmem:[%s912_s2 + $0x10] sm:$0xff] %v339_v51 }
  0xe4   :  { %418 = vst [vmem:[%s912_s2 + $0x28] sm:$0xff] %v341_v41  ;;  %421 = vst [vmem:[%s912_s2 + $0x40] sm:$0xff] %v343_v46  ;;  %v344_v48 = vmul.f32 %v341_v41, %v254_v10  ;;  %v345_v20 = vmul.f32 %v343_v46, %v252_v5 }
  0xe5   :  { %v349_v47 = vsub.f32 %v347_v29, %v348_v18  ;;  %v352_v23 = vsub.f32 %v350_v52, %v351_v3 }
  0xe6   :  { %v346_v60 = vsub.f32 %v344_v48, %v345_v20 }
  0xe7   :  { %v354_v59 = vmul.f32 %v349_v47, %v349_v47  ;;  %v356_v62 = vmul.f32 %v352_v23, %v352_v23 }
  0xe8   :  { %v353_v11 = vmul.f32 %v346_v60, %v346_v60 }
  0xea   :  { %v355_v50 = vadd.f32 %v354_v59, %v353_v11 }
  0xec   :  { %v357_v4 = vadd.f32 %v356_v62, %v355_v50 }
  0xee   :  { %v358_v13 = vmax.f32 %v357_v4, 1e-38  ;;  %vm360_vm2 = vcmp.le.f32.partialorder %v357_v4, 1e-12 }
  0xf0   :  { %442 = vrsqrt.f32 %v358_v13 }
  0xfa   :  { %v443_v0 = vpop.eup %442 }
  0xfb   :  { %v361_v54 = vmul.f32 %v443_v0, %v346_v60  ;;  %v363_v30 = vmul.f32 %v443_v0, %v349_v47  ;;  %v365_v42 = vmul.f32 %v443_v0, %v352_v23 }
  0xfd   :  { %v362_v35 = vsel %vm360_vm2, 0.0, %v361_v54  ;;  %v364_v8 = vsel %vm360_vm2, 1.0, %v363_v30  ;;  %v366_v40 = vsel %vm360_vm2, 0.0, %v365_v42 }
  0xfe   :  { %414 = vst [vmem:[%s912_s2 + $0x8] sm:$0xff] %v362_v35  ;;  %417 = vst [vmem:[%s912_s2 + $0x20] sm:$0xff] %v364_v8 }
  0xff   :  { %420 = vst [vmem:[%s912_s2 + $0x38] sm:$0xff] %v366_v40 }

</bundles_post_ra>
